<compile_context>
chip_gen: v6e
topology: v6e:2x2x1
jax: 0.10.0
libtpu: 0.0.40
codegen_flags: <defaults>
</compile_context>

<pallas_src>
import math

import jax
import jax.numpy as jnp
from jax import lax
from jax.experimental import pallas as pl
from jax.experimental.pallas import tpu as pltpu


def _round_up(x, m):
    return -(-x // m) * m


def _pick_batch_block(n, c, lp, oc, lout, max_block=8):
    """Pick the per-step batch block B (a divisor of n).

    Keeps the double-buffered per-step footprint under a conservative VMEM
    budget (safe against the 16 MiB v5e scoped default and v7x's 64 MiB
    physical VMEM), prefers an even grid length on dual-TensorCore chips
    (v7x) so `parallel` sharding feeds both cores, and otherwise maximizes B
    (single-core v5e/v6e: fewer, bigger pipeline steps).
    """
    budget = 8 * 1024 * 1024

    def fits(b):
        # bf16 input block + f32 output block, double buffered by the pipeline.
        per_step = 2 * (b * c * lp * 2 + b * oc * lout * 4)
        return per_step <= budget

    divisors = [d for d in range(1, min(n, max_block) + 1) if n % d == 0 and fits(d)]
    if not divisors:
        return 1
    try:  # best-effort generation sniff; default to the dual-core-safe choice
        kind = jax.devices()[0].device_kind.lower()
        single_core = ("v5" in kind) or ("v6" in kind)
    except Exception:
        single_core = False
    if not single_core:
        even = [d for d in divisors if (n // d) % 2 == 0]
        if even:
            return max(even)
    return max(divisors)


def flat_conv(x, params, *, batch_block=None):
    """FlatConv forward.  x: (N, C, H, W) f32 -> (N, OC, H, W) f32."""
    N, C, H, W = x.shape
    OC = params["bo"].shape[0]
    Wp = W + 2                       # zero-padded row width
    Lout = H * Wp                    # output lanes per image (pad cols sliced off later)
    Lp = (H + 2) * Wp + 2            # padded flat input length (+2 so the last tap window fits)
    KC = 9 * C                       # tap-stacked contraction size
    Kp = _round_up(KC + 1, 8)        # +1 bias row, rounded up to a sublane multiple

    if batch_block is None:
        batch_block = _pick_batch_block(N, C, Lp, OC, Lout)
    if N % batch_block != 0:
        batch_block = 1
    B = batch_block
    grid = (N // B,)

    # ---- one-time algebraic fold of the 1x1 output conv into the taps ----
    # wb[k][(i*C + o), c] = w_{i+1}[o, c, kh, kw]  with  k = kh*3 + kw
    w_stack = jnp.stack([params["w1"], params["w2"], params["w3"]], axis=0)   # (3, C, C, 3, 3)
    wb = jnp.transpose(w_stack, (3, 4, 0, 1, 2)).reshape(9, 3 * C, C)
    bb = jnp.concatenate([params["b1"], params["b2"], params["b3"]])          # (3C,)
    wo = params["wo"].reshape(OC, 4 * C)
    wo_id, wo_br = wo[:, :C], wo[:, C:]                                       # identity / branch parts

    w_eff = jnp.einsum("oq,kqc->koc", wo_br, wb)                              # (9, OC, C)
    w_eff = w_eff.at[4].add(wo_id)                                            # centre tap carries x itself
    b_eff = wo_br @ bb + params["bo"]                                         # (OC,)

    w_all = jnp.transpose(w_eff, (1, 0, 2)).reshape(OC, KC)                   # column index = k*C + c
    w_pad = jnp.zeros((OC, Kp), jnp.float32)
    w_pad = w_pad.at[:, :KC].set(w_all).at[:, KC].set(b_eff)                  # bias column
    w_pad = w_pad.astype(jnp.bfloat16)                                        # native MXU operand dtype

    # ---- layout plumbing: zero-pad rows, flatten; no border masks needed ----
    xp = jnp.pad(x, ((0, 0), (0, 0), (1, 1), (1, 1)))                         # (N, C, H+2, W+2)
    x_flat = jnp.pad(xp.reshape(N, C, (H + 2) * Wp), ((0, 0), (0, 0), (0, 2)))
    x_flat = x_flat.astype(jnp.bfloat16)                                      # halves input DMA

    def kernel(x_ref, w_ref, out_ref, stage_ref):
        # x_ref: (B, C, Lp) bf16 | w_ref: (OC, Kp) bf16
        # out_ref: (B, OC, Lout) f32 | stage_ref: VMEM scratch (Kp, Lout) bf16
        pad_rows = Kp - KC
        # Constant rows of the staged operand: row KC = ones (bias column),
        # the rest zeros.  Written every step (a few KB) so it is also correct
        # under megacore grid sharding (no reliance on program_id == 0).
        row_ids = lax.broadcasted_iota(jnp.int32, (pad_rows, Lout), 0)
        stage_ref[pl.ds(KC, pad_rows), :] = (row_ids == 0).astype(jnp.bfloat16)

        w = w_ref[...]                               # (OC, Kp) folded weights + bias column
        for b in range(B):                           # static, small batch block
            row = x_ref[b]                           # (C, Lp): load the padded image once
            for kh in range(3):
                for kw in range(3):
                    k = kh * 3 + kw
                    start = kh * Wp + kw             # contiguous shifted window
                    stage_ref[pl.ds(k * C, C), :] = row[:, start:start + Lout]
            # One fused bf16 MXU matmul per image (taps + identity + bias folded).
            out_ref[b] = jnp.dot(w, stage_ref[...],
                                 preferred_element_type=jnp.float32)

    out_flat = pl.pallas_call(
        kernel,
        out_shape=jax.ShapeDtypeStruct((N, OC, Lout), jnp.float32),
        grid=grid,
        in_specs=[
            pl.BlockSpec((B, C, Lp), lambda i: (i, 0, 0)),
            pl.BlockSpec((OC, Kp), lambda i: (0, 0)),
        ],
        out_specs=pl.BlockSpec((B, OC, Lout), lambda i: (i, 0, 0)),
        scratch_shapes=[pltpu.VMEM((Kp, Lout), jnp.bfloat16)],
        compiler_params=pltpu.CompilerParams(dimension_semantics=("parallel",)),
    )(x_flat, w_pad)

    # Drop the two padded columns per row and restore (N, OC, H, W).
    return out_flat.reshape(N, OC, H, Wp)[:, :, :, :W]


# ---------------- deterministic parameter initialization (PyTorch Conv2d default) ----
def init_params(key, C, OC, k=3):
    keys = jax.random.split(key, 8)

    def uinit(kk, shape, fan_in):
        bound = 1.0 / math.sqrt(fan_in)
        return jax.random.uniform(kk, shape, jnp.float32, minval=-bound, maxval=bound)

    return dict(
        w1=uinit(keys[0], (C, C, k, k), C * k * k), b1=uinit(keys[1], (C,), C * k * k),
        w2=uinit(keys[2], (C, C, k, k), C * k * k), b2=uinit(keys[3], (C,), C * k * k),
        w3=uinit(keys[4], (C, C, k, k), C * k * k), b3=uinit(keys[5], (C,), C * k * k),
        wo=uinit(keys[6], (OC, 4 * C, 1, 1), 4 * C), bo=uinit(keys[7], (OC,), 4 * C),
    )


# ---------------- pure-JAX reference (for correctness check) ----------------
def _conv_nchw(x, w, b, p):
    y = lax.conv_general_dilated(x, w, window_strides=(1, 1),
                                 padding=((p, p), (p, p)),
                                 dimension_numbers=("NCHW", "OIHW", "NCHW"),
                                 precision=lax.Precision.HIGHEST)
    return y + b[None, :, None, None]


def reference(x, p):
    c1 = _conv_nchw(x, p["w1"], p["b1"], 1)
    c2 = _conv_nchw(x, p["w2"], p["b2"], 1)
    c3 = _conv_nchw(x, p["w3"], p["b3"], 1)
    cat = jnp.concatenate([x, c1, c2, c3], axis=1)
    return _conv_nchw(cat, p["wo"], p["bo"], 0)


if __name__ == "__main__":
    N, C, H, W, OC = 2, 4, 16, 16, 8
    key = jax.random.PRNGKey(0)
    kx, kp = jax.random.split(key)
    x = jax.random.normal(kx, (N, C, H, W), jnp.float32)
    params = init_params(kp, C, OC)

    y = jax.jit(flat_conv)(x, params)
    jax.block_until_ready(y)

    y_ref = reference(x, params)
    assert y.shape == (N, OC, H, W), y.shape
    max_err = float(jnp.max(jnp.abs(y - y_ref)))
    # bf16 MXU operands (per perf review): bf16 rounding over K = 9C+1 <= 37
    # terms stays well inside this bound.
    assert max_err < 2e-2, f"mismatch vs reference: {max_err}"

    print("KERNEL_OK")
</pallas_src>

<mosaic_0001>
module attributes {stable_mosaic.version = 11 : i64} {
  func.func @kernel(%arg0: i32, %arg1: memref<1x4x326xbf16, #tpu.memory_space<vmem>>, %arg2: memref<8x40xbf16, #tpu.memory_space<vmem>>, %arg3: memref<1x8x288xf32, #tpu.memory_space<vmem>>, %arg4: memref<40x288xbf16, #tpu.memory_space<vmem>>) attributes {dimension_semantics = [#tpu.dimension_semantics<parallel>], iteration_bounds = array<i64: 2>, scalar_prefetch = 0 : i64, scratch_operands = 1 : i64, tpu.core_type = #tpu.core_type<tc>, window_params = [{transform_indices = @transform_0, window_bounds = array<i64: 1, 4, 326>}, {pipeline_mode = #tpu.pipeline_mode<synchronous>, transform_indices = @transform_1, window_bounds = array<i64: 8, 40>}, {transform_indices = @transform_2, window_bounds = array<i64: 1, 8, 288>}]} {
    %0 = tpu.iota {dimensions = array<i32: 0>} : vector<4x288xi32>
    %c0_i32 = arith.constant 0 : i32
    %1 = vector.broadcast %c0_i32 : i32 to vector<4x288xi32>
    %2 = arith.cmpi eq, %0, %1 : vector<4x288xi32>
    %3 = arith.extui %2 : vector<4x288xi1> to vector<4x288xi32>
    %4 = arith.sitofp %3 : vector<4x288xi32> to vector<4x288xf32>
    %5 = arith.truncf %4 : vector<4x288xf32> to vector<4x288xbf16>
    %c36 = arith.constant 36 : index
    %c0 = arith.constant 0 : index
    %6 = vector.load %arg4[%c36, %c0] : memref<40x288xbf16, #tpu.memory_space<vmem>>, vector<4x288xbf16>
    tpu.vector_store %arg4[%c36, %c0], %5 {strides = array<i32>} : memref<40x288xbf16, #tpu.memory_space<vmem>>, vector<4x288xbf16>,
    %c0_0 = arith.constant 0 : index
    %c0_1 = arith.constant 0 : index
    %7 = vector.load %arg2[%c0_0, %c0_1] : memref<8x40xbf16, #tpu.memory_space<vmem>>, vector<8x40xbf16>
    %c0_2 = arith.constant 0 : index
    %c0_3 = arith.constant 0 : index
    %c0_4 = arith.constant 0 : index
    %8 = vector.load %arg1[%c0_2, %c0_3, %c0_4] : memref<1x4x326xbf16, #tpu.memory_space<vmem>>, vector<1x4x326xbf16>
    %9 = vector.shape_cast %8 : vector<1x4x326xbf16> to vector<4x326xbf16>
    %10 = vector.extract_strided_slice %9 {offsets = [0, 0], sizes = [4, 288], strides = [1, 1]} : vector<4x326xbf16> to vector<4x288xbf16>
    %c0_5 = arith.constant 0 : index
    %c0_6 = arith.constant 0 : index
    %11 = vector.load %arg4[%c0_5, %c0_6] : memref<40x288xbf16, #tpu.memory_space<vmem>>, vector<4x288xbf16>
    tpu.vector_store %arg4[%c0_5, %c0_6], %10 {strides = array<i32>} : memref<40x288xbf16, #tpu.memory_space<vmem>>, vector<4x288xbf16>,
    %12 = vector.extract_strided_slice %9 {offsets = [0, 1], sizes = [4, 288], strides = [1, 1]} : vector<4x326xbf16> to vector<4x288xbf16>
    %c4 = arith.constant 4 : index
    %c0_7 = arith.constant 0 : index
    %13 = vector.load %arg4[%c4, %c0_7] : memref<40x288xbf16, #tpu.memory_space<vmem>>, vector<4x288xbf16>
    tpu.vector_store %arg4[%c4, %c0_7], %12 {strides = array<i32>} : memref<40x288xbf16, #tpu.memory_space<vmem>>, vector<4x288xbf16>,
    %14 = vector.extract_strided_slice %9 {offsets = [0, 2], sizes = [4, 288], strides = [1, 1]} : vector<4x326xbf16> to vector<4x288xbf16>
    %c8 = arith.constant 8 : index
    %c0_8 = arith.constant 0 : index
    %15 = vector.load %arg4[%c8, %c0_8] : memref<40x288xbf16, #tpu.memory_space<vmem>>, vector<4x288xbf16>
    tpu.vector_store %arg4[%c8, %c0_8], %14 {strides = array<i32>} : memref<40x288xbf16, #tpu.memory_space<vmem>>, vector<4x288xbf16>,
    %16 = vector.extract_strided_slice %9 {offsets = [0, 18], sizes = [4, 288], strides = [1, 1]} : vector<4x326xbf16> to vector<4x288xbf16>
    %c12 = arith.constant 12 : index
    %c0_9 = arith.constant 0 : index
    %17 = vector.load %arg4[%c12, %c0_9] : memref<40x288xbf16, #tpu.memory_space<vmem>>, vector<4x288xbf16>
    tpu.vector_store %arg4[%c12, %c0_9], %16 {strides = array<i32>} : memref<40x288xbf16, #tpu.memory_space<vmem>>, vector<4x288xbf16>,
    %18 = vector.extract_strided_slice %9 {offsets = [0, 19], sizes = [4, 288], strides = [1, 1]} : vector<4x326xbf16> to vector<4x288xbf16>
    %c16 = arith.constant 16 : index
    %c0_10 = arith.constant 0 : index
    %19 = vector.load %arg4[%c16, %c0_10] : memref<40x288xbf16, #tpu.memory_space<vmem>>, vector<4x288xbf16>
    tpu.vector_store %arg4[%c16, %c0_10], %18 {strides = array<i32>} : memref<40x288xbf16, #tpu.memory_space<vmem>>, vector<4x288xbf16>,
    %20 = vector.extract_strided_slice %9 {offsets = [0, 20], sizes = [4, 288], strides = [1, 1]} : vector<4x326xbf16> to vector<4x288xbf16>
    %c20 = arith.constant 20 : index
    %c0_11 = arith.constant 0 : index
    %21 = vector.load %arg4[%c20, %c0_11] : memref<40x288xbf16, #tpu.memory_space<vmem>>, vector<4x288xbf16>
    tpu.vector_store %arg4[%c20, %c0_11], %20 {strides = array<i32>} : memref<40x288xbf16, #tpu.memory_space<vmem>>, vector<4x288xbf16>,
    %22 = vector.extract_strided_slice %9 {offsets = [0, 36], sizes = [4, 288], strides = [1, 1]} : vector<4x326xbf16> to vector<4x288xbf16>
    %c24 = arith.constant 24 : index
    %c0_12 = arith.constant 0 : index
    %23 = vector.load %arg4[%c24, %c0_12] : memref<40x288xbf16, #tpu.memory_space<vmem>>, vector<4x288xbf16>
    tpu.vector_store %arg4[%c24, %c0_12], %22 {strides = array<i32>} : memref<40x288xbf16, #tpu.memory_space<vmem>>, vector<4x288xbf16>,
    %24 = vector.extract_strided_slice %9 {offsets = [0, 37], sizes = [4, 288], strides = [1, 1]} : vector<4x326xbf16> to vector<4x288xbf16>
    %c28 = arith.constant 28 : index
    %c0_13 = arith.constant 0 : index
    %25 = vector.load %arg4[%c28, %c0_13] : memref<40x288xbf16, #tpu.memory_space<vmem>>, vector<4x288xbf16>
    tpu.vector_store %arg4[%c28, %c0_13], %24 {strides = array<i32>} : memref<40x288xbf16, #tpu.memory_space<vmem>>, vector<4x288xbf16>,
    %26 = vector.extract_strided_slice %9 {offsets = [0, 38], sizes = [4, 288], strides = [1, 1]} : vector<4x326xbf16> to vector<4x288xbf16>
    %c32 = arith.constant 32 : index
    %c0_14 = arith.constant 0 : index
    %27 = vector.load %arg4[%c32, %c0_14] : memref<40x288xbf16, #tpu.memory_space<vmem>>, vector<4x288xbf16>
    tpu.vector_store %arg4[%c32, %c0_14], %26 {strides = array<i32>} : memref<40x288xbf16, #tpu.memory_space<vmem>>, vector<4x288xbf16>,
    %c0_15 = arith.constant 0 : index
    %c0_16 = arith.constant 0 : index
    %28 = vector.load %arg4[%c0_15, %c0_16] : memref<40x288xbf16, #tpu.memory_space<vmem>>, vector<40x288xbf16>
    %cst = arith.constant dense<0.000000e+00> : vector<8x288xf32>
    %29 = tpu.matmul %7, %28, %cst {dimension_numbers = #tpu.dot_dimension_numbers<[1], [0], [0], [1], [0, 0, 1, 1], [], []>} : vector<8x40xbf16>, vector<40x288xbf16>, vector<8x288xf32> -> vector<8x288xf32>
    %c0_17 = arith.constant 0 : index
    %c0_18 = arith.constant 0 : index
    %c0_19 = arith.constant 0 : index
    %30 = vector.load %arg3[%c0_17, %c0_18, %c0_19] : memref<1x8x288xf32, #tpu.memory_space<vmem>>, vector<1x8x288xf32>
    %31 = vector.shape_cast %30 : vector<1x8x288xf32> to vector<8x288xf32>
    %32 = vector.shape_cast %29 : vector<8x288xf32> to vector<1x8x288xf32>
    tpu.vector_store %arg3[%c0_17, %c0_18, %c0_19], %32 {strides = array<i32>} : memref<1x8x288xf32, #tpu.memory_space<vmem>>, vector<1x8x288xf32>,
    return
  }
  func.func @transform_0(%arg0: i32) -> (i32, i32, i32) {
    %c0_i32 = arith.constant 0 : i32
    %c0_i32_0 = arith.constant 0 : i32
    %c0_i32_1 = arith.constant 0 : i32
    return %arg0, %c0_i32, %c0_i32_0 : i32, i32, i32
  }
  func.func @transform_1(%arg0: i32) -> (i32, i32) {
    %c0_i32 = arith.constant 0 : i32
    %c0_i32_0 = arith.constant 0 : i32
    %c0_i32_1 = arith.constant 0 : i32
    return %c0_i32, %c0_i32_0 : i32, i32
  }
  func.func @transform_2(%arg0: i32) -> (i32, i32, i32) {
    %c0_i32 = arith.constant 0 : i32
    %c0_i32_0 = arith.constant 0 : i32
    %c0_i32_1 = arith.constant 0 : i32
    return %arg0, %c0_i32, %c0_i32_0 : i32, i32, i32
  }
}

</mosaic_0001>

<bundles_post_ra>
// kernel: flat_conv.1
= control target key start
LH: loop header
LB: loop body
LE: loop exit
PB: predicated region body
PF: predicated region fallthrough
CT: control target
= control target key end

     0   :  { %s610_s9 = smov 0   ;;  %s659_s0 = inlined_call_operand.vmem [shape: bf16[2,4,326], index: 0, kind: input, shape index: {}]   ;;  %s660_s1 = inlined_call_operand.vmem [shape: bf16[8,40], index: 1, kind: input, shape index: {}]   ;;  %s661_s2 = inlined_call_operand.vmem [shape: f32[2,8,288], index: 2, kind: output, shape index: {}]  }
   0x1 LB: > { %s504_s10 = sadd.s32 4294967295, %s580_s9   ;;  %p508_p0 = scmp.ge.s32.totalorder %s580_s9, 1  ;;  %s580_s9 = sphi %s610_s9, %s12_s9  }
   0x2   : > { %p112_p1 = scmp.lt.s32.totalorder %s580_s9, 3 }
   0x4   : > { %p113_p2 = pnand %p508_p0, %p112_p1 }
   0x5   : > { %p134_p3 = scmp.lt.s32.totalorder (!%p113_p2), %s504_s10, 1  ;;  %s585_s15 = smov (!%p113_p2), 109  }
   0x6   : > { %116 = sbr.rel (%p113_p2) target bundleno = 378 (0x17a), region = 28  ;;  %s586_s16 = smov (!%p113_p2), 90  }
   0x7   : > { %s587_s17 = smov (!%p113_p2), 108   ;;  %s588_s18 = smov (!%p113_p2), 92  }
   0x8   : > { %s589_s19 = smov (!%p113_p2), 91   ;;  %s590_s20 = smov (!%p113_p2), 127  }
   0x9   : > { %s591_s21 = smov (!%p113_p2), 126   ;;  %s593_s22 = smov (!%p113_p2), 110  }
   0xb   : > { %v145_v0 = vlaneseq  ;;  %v582_v1 = vmov 1983009808   ;;  %v583_v3 = vmov 0.0   ;;  %s663_s10 = smov (!%p134_p3, %s504_s10), 1  ;;  %v584_v6 = vmov 839922192  }
   0xc   : > { %v169_v2 = vunpack.c.l.s4 %v582_v1  ;;  %531 = vmatprep.subr.bf16.mxu1 %v583_v3  ;;  %v153_v7 = vunpack.c.l.s4 %v584_v6  ;;  %s541_s11 = smul.u32 6, %s663_s10  ;;  %vm185_vm1 = vcmask 254976   ;;  %vm162_vm2 = vcmask 257026  }
   0xd   : > { %v146_v4 = vshrl.u32 %v145_v0, 7  ;;  %vm592_vm3 = vmmov 0   ;;  %v594_v21 = vmov 0   ;;  %vm201_vm4 = vcmask 1043456   ;;  %s542_s25 = smul.u32 24, %s663_s10 }
   0xe   : > { %v170_v5 = vunpack.c.0.s8 %v169_v2  ;;  %v154_v10 = vunpack.c.0.s8 %v153_v7  ;;  %s138_s14 = scalar_lea.vmem %s659_s0, %s541_s11  ;;  %537 = vmatprep.mubr.msk.bf16.mxu1 %vm592_vm3, %v583_v3  ;;  %396 = vmatprep.mubr.bf16.mxu0 %v594_v21  ;;  %vm242_vm5 = vcmask 891904   ;;  %vm294_vm6 = vcmask 736256  }
   0xf   : > { %vm147_vm0 = vcmp.eq.s32.totalorder %v146_v4, 0  ;;  %v165_v12 = vld [vmem:[%s138_s14] sm:$0x3f]  ;;  %vm268_vm7 = vcmask 752640   ;;  %vm255_vm8 = vcmask 883712   ;;  %vm281_vm9 = vcmask 744448   ;;  %s143_s28 = scalar_lea.vmem %s661_s2, %s542_s25 }
  0x10   : > { %v173_v8 = vsub.s32 %v170_v5, %v146_v4  ;;  %v511_v9 = vsel %vm147_vm0, 1.0, %v583_v3  ;;  %v157_v13 = vsub.s32 %v154_v10, %v146_v4  ;;  %512 = vst.sshfl [vmem:[#allocation2] sm:$0xf pattern:$0x76325410] %v165_v12  ;;  %v167_v15 = vcombine.high %v165_v12, %v165_v12 }
  0x11   : > { %v150_v11 = vpack.c.bf16 %v511_v9, %v511_v9  ;;  %v187_v19 = vcombine.low %v165_v12, %v165_v12  ;;  %vm203_vm10 = vcmask 1039360   ;;  %vm216_vm11 = vcmask 1031168  }
  0x12   : > { %v174_v14 = vrot.slane %v165_v12, %v173_v8  ;;  %v181_v17 = vrot.slane %v167_v15, %v173_v8  ;;  %vm229_vm12 = vcmask 900096   ;;  %vm350_vm13 = vcmask 326656  }
  0x13   : > { %v158_v16 = vrot.slane %v150_v11, %v157_v13  ;;  %v194_v20 = vrot.slane %v187_v19, %v173_v8  ;;  %vm447_vm14 = vcmask 261120  }
  0x14   : > { %235 = vrot.lane.b32.xlu1 %v174_v14, %s585_s15  ;;  %287 = vrot.lane.b32.xlu0 %v174_v14, %s586_s16  ;;  %186 = vst.msk [vmem:[#allocation2 + $0x8] sm:$0x3] %vm185_vm1, %v181_v17 }
  0x15   : > { %v159_v18 = vrot.slane %v158_v16, 6 }
  0x17   : > { %161 = vst [vmem:[#allocation2 + $0x30] sm:$0xcc] %v159_v18 }
  0x18   : > { %250 = vrot.lane.b32.xlu1 %v174_v14, %s587_s17  ;;  %261 = vrot.lane.b32.xlu0 %v174_v14, %s588_s18 }
  0x1c   : > { %237 = vrot.lane.b32.xlu1 %v181_v17, %s585_s15  ;;  %289 = vrot.lane.b32.xlu0 %v181_v17, %s586_s16 }
  0x20   : > { %263 = vrot.lane.b32.xlu1 %v181_v17, %s588_s18  ;;  %248 = vrot.lane.b32.xlu0 %v194_v20, %s587_s17 }
  0x24   : > { %276 = vrot.lane.b32.xlu1 %v174_v14, %s589_s19  ;;  %274 = vrot.lane.b32.xlu0 %v194_v20, %s589_s19 }
  0x28   : > { %197 = vrot.lane.b32.xlu1 %v174_v14, %s590_s20  ;;  %195 = vrot.lane.b32.xlu0 %v194_v20, %s590_s20 }
  0x2c   : > { %211 = vrot.lane.b32.xlu1 %v181_v17, %s591_s21  ;;  %209 = vrot.lane.b32.xlu0 %v174_v14, %s591_s21 }
  0x30   : > { %224 = vrot.lane.b32.xlu1 %v174_v14, %s593_s22  ;;  %222 = vrot.lane.b32.xlu0 %v194_v20, %s593_s22 }
  0x86   : > { %v236_v22 = vpop.permute.xlu1 %235  ;;  %v288_v23 = vpop.permute.xlu0 %287 }
  0x87   : > { %v239_v28 = vrot.slane %v236_v22, 4  ;;  %v291_v29 = vrot.slane %v288_v23, 4 }
  0x8a   : > { %v251_v24 = vpop.permute.xlu1 %250  ;;  %v262_v25 = vpop.permute.xlu0 %261 }
  0x8b   : > { %260 = vst.msk [vmem:[#allocation2 + $0x20] sm:$0xc] %vm162_vm2, %v251_v24  ;;  %v253_v38 = vrot.slane %v251_v24, 4  ;;  %v265_v39 = vrot.slane %v262_v25, 4 }
  0x8e   : > { %v238_v26 = vpop.permute.xlu1 %237  ;;  %v290_v27 = vpop.permute.xlu0 %289 }
  0x8f   : > { %v240_v30 = vrot.slane %v238_v26, 4  ;;  %247 = vst.msk [vmem:[#allocation2 + $0x20] sm:$0x3] %vm185_vm1, %v238_v26  ;;  %v292_v31 = vrot.slane %v290_v27, 4  ;;  %299 = vst.msk [vmem:[#allocation2 + $0x38] sm:$0x3] %vm185_vm1, %v290_v27 }
  0x91   : > { %v241_v32 = vsel %vm201_vm4, %v239_v28, %v240_v30  ;;  %v293_v33 = vsel %vm201_vm4, %v291_v29, %v292_v31 }
  0x92   : > { %v243_v34 = vsel %vm242_vm5, %v236_v22, %v241_v32  ;;  %v295_v35 = vsel %vm294_vm6, %v288_v23, %v293_v33  ;;  %v264_v36 = vpop.permute.xlu1 %263  ;;  %v249_v37 = vpop.permute.xlu0 %248 }
  0x93   : > { %246 = vst [vmem:[#allocation2 + $0x18] sm:$0x33] %v243_v34  ;;  %298 = vst [vmem:[#allocation2 + $0x30] sm:$0x33] %v295_v35  ;;  %v266_v40 = vrot.slane %v264_v36, 4  ;;  %v252_v41 = vrot.slane %v249_v37, 4 }
  0x94   : > { %273 = vst.msk [vmem:[#allocation2 + $0x2c] sm:$0x3] %vm185_vm1, %v264_v36 }
  0x95   : > { %v267_v42 = vsel %vm201_vm4, %v265_v39, %v266_v40  ;;  %v254_v43 = vsel %vm201_vm4, %v252_v41, %v253_v38 }
  0x96   : > { %v269_v44 = vsel %vm268_vm7, %v262_v25, %v267_v42  ;;  %v256_v45 = vsel %vm255_vm8, %v249_v37, %v254_v43  ;;  %v277_v46 = vpop.permute.xlu1 %276  ;;  %v275_v47 = vpop.permute.xlu0 %274  ;;  %v564_v48 = vld [vmem:[#allocation2 + $0x38] ss:$0 sps:$4 sm:$0xff]  }
  0x97   : > { %272 = vst [vmem:[#allocation2 + $0x24] sm:$0x33] %v269_v44  ;;  %259 = vst [vmem:[#allocation2 + $0x18] sm:$0xcc] %v256_v45  ;;  %v279_v49 = vrot.slane %v277_v46, 4  ;;  %v278_v50 = vrot.slane %v275_v47, 4 }
  0x98   : > { %286 = vst.msk [vmem:[#allocation2 + $0x2c] sm:$0xc] %vm162_vm2, %v277_v46  ;;  %v362_v51 = vsel %vm201_vm4, %v564_v48, 0 }
  0x99   : > { %v280_v52 = vsel %vm201_vm4, %v278_v50, %v279_v49  ;;  %532 = vmatpush3.bf16.msra.mxu1 %v362_v51 }
  0x9a   : > { %v282_v53 = vsel %vm281_vm9, %v275_v47, %v280_v52  ;;  %v198_v54 = vpop.permute.xlu1 %197  ;;  %v196_v55 = vpop.permute.xlu0 %195  ;;  %v308_v56 = vld [vmem:[#allocation2 + $0x30] sm:$0xff]  ;;  %533 = vmatprep.subr.bf16.mxu1 %v583_v3 }
  0x9b   : > { %285 = vst [vmem:[#allocation2 + $0x24] sm:$0xcc] %v282_v53  ;;  %v200_v57 = vrot.slane %v198_v54, 4  ;;  %208 = vst.msk [vmem:[#allocation2 + $0x8] sm:$0xc] %vm162_vm2, %v198_v54  ;;  %v199_v58 = vrot.slane %v196_v55, 4  ;;  %v520_v59 = vcombine.high %v308_v56, %v308_v56  ;;  %v519_v60 = vcombine.low %v308_v56, %v308_v56 }
  0x9d   : > { %v202_v61 = vsel %vm201_vm4, %v199_v58, %v200_v57  ;;  %522 = vmatprep.subr.msk.bf16.mxu0 %vm201_vm4, %v520_v59  ;;  %v356_v62 = vsel %vm201_vm4, %v519_v60, 0 }
  0x9e   : > { %v204_v63 = vsel %vm203_vm10, %v196_v55, %v202_v61  ;;  %v212_v0 = vpop.permute.xlu1 %211  ;;  %375 = vmatpush1.bf16.msra.mxu0 %v356_v62  ;;  %v210_v1 = vpop.permute.xlu0 %209 }
  0x9f   : > { %v566_v2 = vld [vmem:[#allocation2 + $0x20] ss:$12 sps:$4 sm:$0xff]   ;;  %207 = vst [vmem:[#allocation2] sm:$0xcc] %v204_v63  ;;  %v214_v4 = vrot.slane %v212_v0, 4  ;;  %v213_v5 = vrot.slane %v210_v1, 4 }
  0xa0   : > { %221 = vst.msk [vmem:[#allocation2 + $0x14] sm:$0x3] %vm185_vm1, %v212_v0  ;;  %534 = vmatpush3.bf16.msra.mxu1 %v566_v2 }
  0xa1   : > { %v215_v6 = vsel %vm201_vm4, %v213_v5, %v214_v4  ;;  %535 = vmatprep.subr.bf16.mxu1 %v583_v3  ;;  %v164_v3 = vld [vmem:[%s660_s1] sm:$0xf] }
  0xa2   : > { %v217_v7 = vsel %vm216_vm11, %v210_v1, %v215_v6  ;;  %v225_v8 = vpop.permute.xlu1 %224  ;;  %v223_v9 = vpop.permute.xlu0 %222  ;;  %v567_v10 = vld [vmem:[#allocation2 + $0x1c] ss:$12 sps:$4 sm:$0xff]   ;;  %v569_v11 = vld [vmem:[#allocation2 + $0x18] ss:$12 sps:$4 sm:$0xff]  }
  0xa3   : > { %220 = vst [vmem:[#allocation2 + $0xc] sm:$0x33] %v217_v7  ;;  %v227_v12 = vrot.slane %v225_v8, 4  ;;  %234 = vst.msk [vmem:[#allocation2 + $0x14] sm:$0xc] %vm162_vm2, %v225_v8  ;;  %v226_v13 = vrot.slane %v223_v9, 4  ;;  %376 = vmatprep.subr.bf16.mxu0 %v567_v10 }
  0xa4   : > { %377 = vmatpush1.bf16.msra.mxu0 %v569_v11 }
  0xa5   : > { %v228_v14 = vsel %vm201_vm4, %v226_v13, %v227_v12 }
  0xa6   : > { %v230_v15 = vsel %vm229_vm12, %v223_v9, %v228_v14 }
  0xa7   : > { %233 = vst [vmem:[#allocation2 + $0xc] sm:$0xcc] %v230_v15 }
  0xaa   : > { %v570_v16 = vld [vmem:[#allocation2 + $0x8] ss:$12 sps:$4 sm:$0xff]  }
  0xab   : > { %536 = vmatpush3.bf16.msra.mxu1 %v570_v16 }
  0xae   : > { %v571_v17 = vld [vmem:[#allocation2 + $0x4] ss:$12 sps:$4 sm:$0xff]   ;;  %v573_v18 = vld [vmem:[#allocation2] ss:$12 sps:$4 sm:$0xff]   ;;  %538 = vmatmul.mubr.msk.bf16.vlgmr.msra.gmra.mxu1 %vm350_vm13, %v164_v3 }
  0xaf   : > { %378 = vmatprep.subr.bf16.mxu0 %v571_v17 }
  0xb0   : > { %379 = vmatpush1.bf16.msra.mxu0 %v573_v18 }
  0xb3   : > { %523 = vmatmul.mubr.msk.bf16.vlgmr.msra.gmra.mxu0 %vm350_vm13, %v164_v3 }
 0x16e   : > { %v439_v19 = vpop.f32.mrf.mxu1 }
 0x16f   : > { %448 = vst.msk [vmem:[%s143_s28 + $0x10] sm:$0xff] %vm447_vm14, %v439_v19 }
 0x170   : > { %v539_v20 = vpop.f32.mrf.mxu1 }
 0x172   : > { %v442_v21 = vpop.f32.mrf.mxu1 }
 0x173   : > { %v398_v22 = vpop.f32.mrf.mxu0 }
 0x174   : > { %445 = vst [vmem:[%s143_s28] sm:$0xff] %v398_v22  ;;  %v540_v23 = vpop.f32.mrf.mxu1 }
 0x175   : > { %v400_v24 = vpop.f32.mrf.mxu0 }
 0x176   : > { %446 = vst [vmem:[%s143_s28 + $0x8] sm:$0xff] %v400_v24 }
 0x177   : > { %v402_v25 = vpop.f32.mrf.mxu0 }
 0x179   : > { %v403_v26 = vpop.f32.mrf.mxu0 }
 0x17a PF: > { %s12_s9 = sadd.s32 1, %s580_s9  }
 0x17b   : > { %p9_p4 = scmp.ge.s32.totalorder %s12_s9, 4  }
 0x17d   :  { %11 = sbr.rel (!%p9_p4) target bundleno = 1 (0x1), region = 58 }

</bundles_post_ra>
